<compile_context>
chip_gen: v6e
topology: v6e:2x2x1
jax: 0.10.0
libtpu: 0.0.40
codegen_flags: <defaults>
</compile_context>

<pallas_src>
import functools

import jax
import jax.numpy as jnp
from jax.experimental import pallas as pl
from jax.experimental.pallas import tpu as pltpu

LAYER_DIMS = [(20, 2), (20, 20), (15, 20), (10, 15), (1, 10)]  # (out, in), PyTorch layout
ROW_OFF = [0, 24, 48, 64, 80]   # 8-aligned sublane offset of each weight block
PACK_ROWS = 88                  # multiple of 8 (sublane tile)
PACK_COLS = 128                 # full lane width -> unmasked params DMA
BIAS_COL = 127                  # biases stored as a column -> (out, 1) lane-broadcast


def mlp_kernel(x_ref, p_ref, out_ref):
    # x_ref: (2, TILE)   p_ref: (PACK_ROWS, PACK_COLS)   out_ref: (1, TILE)
    h = x_ref[...]
    for li, (out_f, in_f) in enumerate(LAYER_DIMS):        # static unroll (5 layers)
        r = ROW_OFF[li]
        w = p_ref[r:r + out_f, 0:in_f]                     # (out, in)  static slice
        b = p_ref[r:r + out_f, BIAS_COL:BIAS_COL + 1]      # (out, 1)   static slice
        h = jnp.dot(w, h, preferred_element_type=jnp.float32) + b
        if li < len(LAYER_DIMS) - 1:
            h = jnp.tanh(h)
    out_ref[...] = h


def init_params(key):
    """Matches the PyTorch init: weights ~ Normal(0, 0.1), biases = 0."""
    weights, biases = [], []
    for out_f, in_f in LAYER_DIMS:
        key, sub = jax.random.split(key)
        weights.append(0.1 * jax.random.normal(sub, (out_f, in_f), dtype=jnp.float32))
        biases.append(jnp.zeros((out_f,), dtype=jnp.float32))
    return weights, biases


def pack_params(weights, biases):
    """Pack all weights/biases into one padded (PACK_ROWS, PACK_COLS) array."""
    packed = jnp.zeros((PACK_ROWS, PACK_COLS), dtype=jnp.float32)
    for (out_f, in_f), r, w, b in zip(LAYER_DIMS, ROW_OFF, weights, biases):
        packed = packed.at[r:r + out_f, 0:in_f].set(w.astype(jnp.float32))
        packed = packed.at[r:r + out_f, BIAS_COL].set(b.astype(jnp.float32))
    return packed


def _round_up(n, m):
    return ((n + m - 1) // m) * m


@functools.partial(jax.jit, static_argnames=("max_batch_tile",))
def neural_network_fine_forward(x, packed_params, *, max_batch_tile=16384):
    x = x.astype(jnp.float32)
    B = x.shape[0]

    # --- choose a lane-aligned batch tile -----------------------------------
    b_pad = _round_up(B, 128)
    tile = min(b_pad, max(128, (max_batch_tile // 128) * 128))
    # Keep >= 2 grid steps whenever the batch allows, so the "parallel" batch
    # axis can be sharded across v7x's two TensorCores (free ~2x there).
    if b_pad >= 256:
        half = max(128, (b_pad // 2) // 128 * 128)
        tile = min(tile, half)
    b_pad = _round_up(b_pad, tile)

    # Transpose + pad as one fused expression: batch -> lanes, single copy.
    xT = jnp.pad(x.T, ((0, 0), (0, b_pad - B)))            # (2, b_pad)

    out_t = pl.pallas_call(
        mlp_kernel,
        out_shape=jax.ShapeDtypeStruct((1, b_pad), jnp.float32),
        grid=(b_pad // tile,),
        in_specs=[
            pl.BlockSpec((2, tile), lambda i: (0, i)),                 # batch tile
            pl.BlockSpec((PACK_ROWS, PACK_COLS), lambda i: (0, 0)),    # resident params
        ],
        out_specs=pl.BlockSpec((1, tile), lambda i: (0, i)),
        compiler_params=pltpu.CompilerParams(
            dimension_semantics=("parallel",)),
    )(xT, packed_params)

    return out_t[:, :B].T                                  # (B, 1)


if __name__ == "__main__":
    key = jax.random.PRNGKey(0)
    pkey, xkey = jax.random.split(key)

    weights, biases = init_params(pkey)
    packed = pack_params(weights, biases)

    # Small batch of 2-feature inputs, consistent with nn.Linear(2, 20).
    x = jax.random.normal(xkey, (8, 2), dtype=jnp.float32)

    out = neural_network_fine_forward(x, packed)
    jax.block_until_ready(out)

    # Pure-JAX reference (PyTorch semantics: y = x @ W.T + b, tanh between layers).
    ref = x
    for i, (w, b) in enumerate(zip(weights, biases)):
        ref = ref @ w.T + b
        if i < len(weights) - 1:
            ref = jnp.tanh(ref)

    assert out.shape == (8, 1)
    assert jnp.allclose(out, ref, atol=2e-5, rtol=2e-5)

    print("KERNEL_OK")
</pallas_src>

<mosaic_0001>
module attributes {stable_mosaic.version = 11 : i64} {
  func.func @mlp_kernel(%arg0: i32, %arg1: memref<2x128xf32, #tpu.memory_space<vmem>>, %arg2: memref<88x128xf32, #tpu.memory_space<vmem>>, %arg3: memref<1x128xf32, #tpu.memory_space<vmem>>) attributes {dimension_semantics = [#tpu.dimension_semantics<parallel>], iteration_bounds = array<i64: 1>, scalar_prefetch = 0 : i64, scratch_operands = 0 : i64, tpu.core_type = #tpu.core_type<tc>, window_params = [{transform_indices = @transform_0, window_bounds = array<i64: 2, 128>}, {pipeline_mode = #tpu.pipeline_mode<synchronous>, transform_indices = @transform_1, window_bounds = array<i64: 88, 128>}, {transform_indices = @transform_2, window_bounds = array<i64: 1, 128>}]} {
    %c0 = arith.constant 0 : index
    %c0_0 = arith.constant 0 : index
    %0 = vector.load %arg1[%c0, %c0_0] : memref<2x128xf32, #tpu.memory_space<vmem>>, vector<2x128xf32>
    %c0_1 = arith.constant 0 : index
    %c0_2 = arith.constant 0 : index
    %1 = vector.load %arg2[%c0_1, %c0_2] : memref<88x128xf32, #tpu.memory_space<vmem>>, vector<20x2xf32>
    %c0_3 = arith.constant 0 : index
    %c127 = arith.constant 127 : index
    %2 = vector.load %arg2[%c0_3, %c127] : memref<88x128xf32, #tpu.memory_space<vmem>>, vector<20x1xf32>
    %cst = arith.constant dense<0.000000e+00> : vector<20x128xf32>
    %3 = tpu.matmul %1, %0, %cst {dimension_numbers = #tpu.dot_dimension_numbers<[1], [0], [0], [1], [0, 0, 1, 1], [], []>} : vector<20x2xf32>, vector<2x128xf32>, vector<20x128xf32> -> vector<20x128xf32>
    %4 = vector.broadcast %2 : vector<20x1xf32> to vector<20x128xf32>
    %5 = arith.addf %3, %4 : vector<20x128xf32>
    %6 = math.tanh %5 : vector<20x128xf32>
    %c24 = arith.constant 24 : index
    %c0_4 = arith.constant 0 : index
    %7 = vector.load %arg2[%c24, %c0_4] : memref<88x128xf32, #tpu.memory_space<vmem>>, vector<20x20xf32>
    %c24_5 = arith.constant 24 : index
    %c127_6 = arith.constant 127 : index
    %8 = vector.load %arg2[%c24_5, %c127_6] : memref<88x128xf32, #tpu.memory_space<vmem>>, vector<20x1xf32>
    %cst_7 = arith.constant dense<0.000000e+00> : vector<20x128xf32>
    %9 = tpu.matmul %7, %6, %cst_7 {dimension_numbers = #tpu.dot_dimension_numbers<[1], [0], [0], [1], [0, 0, 1, 1], [], []>} : vector<20x20xf32>, vector<20x128xf32>, vector<20x128xf32> -> vector<20x128xf32>
    %10 = vector.broadcast %8 : vector<20x1xf32> to vector<20x128xf32>
    %11 = arith.addf %9, %10 : vector<20x128xf32>
    %12 = math.tanh %11 : vector<20x128xf32>
    %c48 = arith.constant 48 : index
    %c0_8 = arith.constant 0 : index
    %13 = vector.load %arg2[%c48, %c0_8] : memref<88x128xf32, #tpu.memory_space<vmem>>, vector<15x20xf32>
    %c48_9 = arith.constant 48 : index
    %c127_10 = arith.constant 127 : index
    %14 = vector.load %arg2[%c48_9, %c127_10] : memref<88x128xf32, #tpu.memory_space<vmem>>, vector<15x1xf32>
    %cst_11 = arith.constant dense<0.000000e+00> : vector<15x128xf32>
    %15 = tpu.matmul %13, %12, %cst_11 {dimension_numbers = #tpu.dot_dimension_numbers<[1], [0], [0], [1], [0, 0, 1, 1], [], []>} : vector<15x20xf32>, vector<20x128xf32>, vector<15x128xf32> -> vector<15x128xf32>
    %16 = vector.broadcast %14 : vector<15x1xf32> to vector<15x128xf32>
    %17 = arith.addf %15, %16 : vector<15x128xf32>
    %18 = math.tanh %17 : vector<15x128xf32>
    %c64 = arith.constant 64 : index
    %c0_12 = arith.constant 0 : index
    %19 = vector.load %arg2[%c64, %c0_12] : memref<88x128xf32, #tpu.memory_space<vmem>>, vector<10x15xf32>
    %c64_13 = arith.constant 64 : index
    %c127_14 = arith.constant 127 : index
    %20 = vector.load %arg2[%c64_13, %c127_14] : memref<88x128xf32, #tpu.memory_space<vmem>>, vector<10x1xf32>
    %cst_15 = arith.constant dense<0.000000e+00> : vector<10x128xf32>
    %21 = tpu.matmul %19, %18, %cst_15 {dimension_numbers = #tpu.dot_dimension_numbers<[1], [0], [0], [1], [0, 0, 1, 1], [], []>} : vector<10x15xf32>, vector<15x128xf32>, vector<10x128xf32> -> vector<10x128xf32>
    %22 = vector.broadcast %20 : vector<10x1xf32> to vector<10x128xf32>
    %23 = arith.addf %21, %22 : vector<10x128xf32>
    %24 = math.tanh %23 : vector<10x128xf32>
    %c80 = arith.constant 80 : index
    %c0_16 = arith.constant 0 : index
    %25 = vector.load %arg2[%c80, %c0_16] : memref<88x128xf32, #tpu.memory_space<vmem>>, vector<1x10xf32>
    %c80_17 = arith.constant 80 : index
    %c127_18 = arith.constant 127 : index
    %26 = vector.load %arg2[%c80_17, %c127_18] : memref<88x128xf32, #tpu.memory_space<vmem>>, vector<1x1xf32>
    %cst_19 = arith.constant dense<0.000000e+00> : vector<1x128xf32>
    %27 = tpu.matmul %25, %24, %cst_19 {dimension_numbers = #tpu.dot_dimension_numbers<[1], [0], [0], [1], [0, 0, 1, 1], [], []>} : vector<1x10xf32>, vector<10x128xf32>, vector<1x128xf32> -> vector<1x128xf32>
    %28 = vector.broadcast %26 : vector<1x1xf32> to vector<1x128xf32>
    %29 = arith.addf %27, %28 : vector<1x128xf32>
    %c0_20 = arith.constant 0 : index
    %c0_21 = arith.constant 0 : index
    %30 = vector.load %arg3[%c0_20, %c0_21] : memref<1x128xf32, #tpu.memory_space<vmem>>, vector<1x128xf32>
    tpu.vector_store %arg3[%c0_20, %c0_21], %29 {strides = array<i32>} : memref<1x128xf32, #tpu.memory_space<vmem>>, vector<1x128xf32>,
    return
  }
  func.func @transform_0(%arg0: i32) -> (i32, i32) {
    %c0_i32 = arith.constant 0 : i32
    %c0_i32_0 = arith.constant 0 : i32
    return %c0_i32, %arg0 : i32, i32
  }
  func.func @transform_1(%arg0: i32) -> (i32, i32) {
    %c0_i32 = arith.constant 0 : i32
    %c0_i32_0 = arith.constant 0 : i32
    %c0_i32_1 = arith.constant 0 : i32
    return %c0_i32, %c0_i32_0 : i32, i32
  }
  func.func @transform_2(%arg0: i32) -> (i32, i32) {
    %c0_i32 = arith.constant 0 : i32
    %c0_i32_0 = arith.constant 0 : i32
    return %c0_i32, %arg0 : i32, i32
  }
}

</mosaic_0001>

<bundles_post_ra>
// kernel: neural_network_fine_forward.1
= control target key start
LH: loop header
LB: loop body
LE: loop exit
PB: predicated region body
PF: predicated region fallthrough
CT: control target
= control target key end

     0   :  { %7 = vsyncpa [#allocation3], 0  ;;  %s669_s9 = smov [#allocation2]   ;;  %s750_s0 = inlined_call_operand.vmem [shape: f32[2,128], index: 0, kind: input, shape index: {}]   ;;  %s751_s1 = inlined_call_operand.hbm [shape: f32[88,128], index: 1, kind: input, shape index: {}]   ;;  %s752_s2 = inlined_call_operand.vmem [shape: f32[1,128], index: 2, kind: output, shape index: {}]  }
   0x1   :  { %s15_s10 = sshll.u32 %s669_s9, 4  ;;  %s16_s10 = int_to_ptr.vmem [resolvable:$true] %s15_s10 }
   0x2   :  { %s655_s11 = scalar_lea.vmem %s16_s10, 1408  ;;  %p660_p1 = scmp.lt.s32.totalorder %s16_s10, %s16_s10 }
   0x3   :  { %p656_p0 = scmp.ne.s32.totalorder %s16_s10, %s655_s11  ;;  %p661_p2 = scmp.lt.s32.totalorder %s655_s11, %s655_s11 }
   0x5   :  { %p662_p3 = por %p661_p2, %p660_p1 }
   0x7   :  { %p663_p4 = pnand %p662_p3, %p656_p0 }
   0x9   :  { %666 = shalt.err (!%p663_p4)
}
   0xa   :  { %s670_s12 = smov 128   ;;  %s671_s13 = smov 8  }
   0xb   :  { %21 = dma.hbm_to_vmem [thread:$0]  %s751_s1, 1408, %s16_s10, [#allocation3], %s670_s12, %s670_s12, %s671_s13  }
   0xc   :  { %667 = dma.done.wait [#allocation3], 1408  }
   0xd   :  { %668 = vsyncadd [#allocation3], 4294965888  ;;  %v672_v0 = vmov 0.0   ;;  %vm673_vm0 = vmmov 0   ;;  %v674_v1 = vmov 127   ;;  %vm51_vm1 = vcmask 1041408  }
   0xe   :  { %570 = vmatprep.subr.mxu0 %v672_v0  ;;  %572 = vmatprep.mubr.msk.f32.mxu0 %vm673_vm0, %v672_v0  ;;  %vm44_vm2 = vcmask 15360   ;;  %v25_v2 = vld [vmem:[%s750_s0] sm:$0x3]  ;;  %v28_v4 = vld [vmem:[#allocation2 + $0x10] sm:$0xf]  ;;  %v27_v6 = vld [vmem:[#allocation2 + $0x8] sm:$0xff] }
   0xf   :  { %625 = vset.pattern.permute.xlu0 %v674_v1  ;;  %626 = vset.pattern.permute.xlu1 %v674_v1  ;;  %v26_v3 = vld [vmem:[#allocation2] sm:$0xff]  ;;  %v140_v5 = vld [vmem:[#allocation2 + $0x28] sm:$0xf]  ;;  %v138_v7 = vld [vmem:[#allocation2 + $0x18] sm:$0xff]  ;;  %vm156_vm3 = vcmask 162816   ;;  %vm163_vm4 = vcmask 1043456  }
  0x10   :  { %581 = vmatprep.subr.mxu1 %v672_v0  ;;  %587 = vmatprep.mubr.msk.f32.mxu1 %vm673_vm0, %v672_v0  ;;  %v139_v8 = vld [vmem:[#allocation2 + $0x20] sm:$0xff]  ;;  %v250_v9 = vld [vmem:[#allocation2 + $0x30] sm:$0xff]  ;;  %v710_v10 = vld [vmem:[#allocation2 + $0x38] sm:$0x7f]  ;;  %vm358_vm5 = vcmask 121856   ;;  %vm363_vm6 = vcmask 1046528  }
  0x11   :  { %571 = vmatpush3.msk.msra.mxu0 %vm51_vm1, %v25_v2  ;;  %31 = vperm.xlu1 %626, %v26_v3   ;;  %v713_v11 = vld [vmem:[#allocation2 + $0x40] sm:$0xff]  ;;  %v715_v12 = vld [vmem:[#allocation2 + $0x48] sm:$0x3]  ;;  %v719_v13 = vld [vmem:[#allocation2 + $0x50] sm:$0x1]  ;;  %vm450_vm7 = vcmask 80896  }
  0x12   :  { %573 = vmatmul.mubr.msk.f32.vlgmr.msra.gmra.mxu0 %vm44_vm2, %v26_v3  ;;  %41 = vperm.xlu0 %625, %v28_v4  }
  0x13   :  { %575 = vmatprep.mubr.msk.f32.mxu0 %vm673_vm0, %v672_v0 }
  0x15   :  { %153 = vperm.xlu1 %626, %v140_v5  }
  0x16   :  { %576 = vmatmul.mubr.msk.f32.gmra.mxu0 %vm44_vm2, %v27_v6  ;;  %36 = vperm.xlu0 %625, %v27_v6  }
  0x17   :  { %578 = vmatprep.mubr.msk.f32.mxu0 %vm673_vm0, %v672_v0 }
  0x19   :  { %143 = vperm.xlu1 %626, %v138_v7  }
  0x1a   :  { %579 = vmatmul.mubr.msk.f32.gmra.mxu0 %vm44_vm2, %v28_v4  ;;  %148 = vperm.xlu0 %625, %v139_v8  }
  0x1b   :  { %602 = vmatprep.mubr.msk.f32.mxu0 %vm156_vm3, %v250_v9 }
  0x1d   :  { %254 = vperm.xlu1 %626, %v250_v9  }
  0x1e   :  { %259 = vperm.xlu0 %625, %v710_v10  }
  0x21   :  { %350 = vperm.xlu1 %626, %v713_v11  }
  0x22   :  { %355 = vperm.xlu0 %625, %v715_v12  }
  0x26   :  { %447 = vperm.xlu0 %625, %v719_v13  }
  0x8c   :  { %v32_v23 = vpop.permute.xlu1 %31 }
  0x8d   :  { %v42_v15 = vpop.permute.xlu0 %41 }
  0x90   :  { %v154_v31 = vpop.permute.xlu1 %153 }
  0x91   :  { %v37_v19 = vpop.permute.xlu0 %36 }
  0x94   :  { %v144_v38 = vpop.permute.xlu1 %143 }
  0x95   :  { %v149_v34 = vpop.permute.xlu0 %148 }
  0x98   :  { %v255_v47 = vpop.permute.xlu1 %254 }
  0x99   :  { %v260_v44 = vpop.permute.xlu0 %259 }
  0x9c   :  { %v351_v55 = vpop.permute.xlu1 %350 }
  0x9d   :  { %v356_v52 = vpop.permute.xlu0 %355 }
  0xa1   :  { %v448_v60 = vpop.permute.xlu0 %447 }
  0xd2   :  { %v121_v14 = vpop.f32.mrf.mxu0 }
  0xd3   :  { %v122_v25 = vadd.f32 %v121_v14, %v32_v23 }
  0xd4   :  { %v574_v16 = vpop.f32.mrf.mxu0 }
  0xd6   :  { %v126_v17 = vpop.f32.mrf.mxu0 }
  0xd7   :  { %v127_v21 = vadd.f32 %v126_v17, %v37_v19 }
  0xd8   :  { %v577_v18 = vpop.f32.mrf.mxu0 }
  0xda   :  { %v131_v20 = vpop.f32.mrf.mxu0 }
  0xdb   :  { %v132_v22 = vadd.f32 %v131_v20, %v42_v15 }
  0xdc   :  { %v580_v24 = vpop.f32.mrf.mxu0 }
  0xdd   :  { %627 = vtanh.f32 %v132_v22 }
  0xde   :  { %629 = vtanh.f32 %v127_v21 }
  0xdf   :  { %631 = vtanh.f32 %v122_v25 }
  0xea   :  { %v628_v26 = vpop.eup %627 }
  0xeb   :  { %582 = vmatpush3.msk.msra.mxu1 %vm163_vm4, %v628_v26  ;;  %v630_v27 = vpop.eup %629 }
  0xec   :  { %583 = vmatprep.subr.mxu1 %v672_v0  ;;  %v632_v28 = vpop.eup %631 }
  0xed   :  { %584 = vmatpush3.msra.mxu1 %v630_v27 }
  0xee   :  { %585 = vmatprep.subr.mxu1 %v672_v0 }
  0xef   :  { %586 = vmatpush3.msra.mxu1 %v632_v28 }
  0xf0   :  { %588 = vmatmul.mubr.msk.f32.vlgmr.msra.gmra.mxu1 %vm156_vm3, %v138_v7  ;;  %612 = vmatprep.subr.mxu1 %v672_v0 }
  0xf1   :  { %590 = vmatprep.mubr.msk.f32.mxu1 %vm673_vm0, %v672_v0 }
  0xf4   :  { %591 = vmatmul.mubr.msk.f32.gmra.mxu1 %vm156_vm3, %v139_v8 }
  0xf5   :  { %593 = vmatprep.mubr.msk.f32.mxu1 %vm673_vm0, %v672_v0 }
  0xf8   :  { %594 = vmatmul.mubr.msk.f32.gmra.mxu1 %vm156_vm3, %v140_v5 }
  0xf9   :  { %616 = vmatprep.mubr.msk.f32.mxu1 %vm673_vm0, %v672_v0 }
 0x1b0   :  { %v233_v29 = vpop.f32.mrf.mxu1 }
 0x1b1   :  { %v234_v40 = vadd.f32 %v233_v29, %v144_v38 }
 0x1b2   :  { %v589_v30 = vpop.f32.mrf.mxu1 }
 0x1b4   :  { %v238_v32 = vpop.f32.mrf.mxu1 }
 0x1b5   :  { %v239_v36 = vadd.f32 %v238_v32, %v149_v34 }
 0x1b6   :  { %v592_v33 = vpop.f32.mrf.mxu1 }
 0x1b8   :  { %v243_v35 = vpop.f32.mrf.mxu1 }
 0x1b9   :  { %v244_v37 = vadd.f32 %v243_v35, %v154_v31 }
 0x1ba   :  { %v595_v39 = vpop.f32.mrf.mxu1 }
 0x1bb   :  { %633 = vtanh.f32 %v244_v37 }
 0x1bc   :  { %635 = vtanh.f32 %v239_v36 }
 0x1bd   :  { %637 = vtanh.f32 %v234_v40 }
 0x1c8   :  { %v634_v41 = vpop.eup %633 }
 0x1c9   :  { %596 = vmatprep.subr.msk.mxu0 %vm163_vm4, %v634_v41  ;;  %v636_v42 = vpop.eup %635 }
 0x1ca   :  { %597 = vmatpush3.msk.msra.mxu0 %vm163_vm4, %v634_v41  ;;  %v638_v43 = vpop.eup %637 }
 0x1cb   :  { %598 = vmatprep.subr.mxu0 %v636_v42 }
 0x1cc   :  { %599 = vmatpush3.msra.mxu0 %v636_v42 }
 0x1cd   :  { %600 = vmatprep.subr.mxu0 %v638_v43 }
 0x1ce   :  { %601 = vmatpush3.msra.mxu0 %v638_v43 }
 0x1cf   :  { %603 = vmatmul.mubr.msk.f32.vlgmr.msra.gmra.mxu0 %vm156_vm3, %v710_v10 }
 0x1d0   :  { %609 = vmatprep.mubr.msk.f32.mxu0 %vm358_vm5, %v713_v11 }
 0x28f   :  { %v604_v45 = vpop.f32.mrf.mxu0 }
 0x290   :  { %v341_v46 = vadd.f32 %v604_v45, %v260_v44 }
 0x291   :  { %v335_v48 = vpop.f32.mrf.mxu0 }
 0x292   :  { %639 = vtanh.f32 %v341_v46  ;;  %v336_v49 = vadd.f32 %v335_v48, %v255_v47 }
 0x294   :  { %641 = vtanh.f32 %v336_v49 }
 0x29f   :  { %v640_v50 = vpop.eup %639 }
 0x2a0   :  { %605 = vmatprep.subr.msk.mxu0 %vm363_vm6, %v640_v50 }
 0x2a1   :  { %v642_v51 = vpop.eup %641  ;;  %606 = vmatpush3.msk.msra.mxu0 %vm363_vm6, %v640_v50 }
 0x2a2   :  { %607 = vmatprep.subr.mxu0 %v642_v51 }
 0x2a3   :  { %608 = vmatpush3.msra.mxu0 %v642_v51 }
 0x2a4   :  { %610 = vmatmul.mubr.msk.f32.vlgmr.msra.gmra.mxu0 %vm358_vm5, %v715_v12 }
 0x364   :  { %v611_v53 = vpop.f32.mrf.mxu0 }
 0x365   :  { %v439_v54 = vadd.f32 %v611_v53, %v356_v52 }
 0x366   :  { %v433_v56 = vpop.f32.mrf.mxu0 }
 0x367   :  { %643 = vtanh.f32 %v439_v54  ;;  %v434_v57 = vadd.f32 %v433_v56, %v351_v55 }
 0x369   :  { %645 = vtanh.f32 %v434_v57 }
 0x374   :  { %v644_v58 = vpop.eup %643 }
 0x375   :  { %613 = vmatpush3.msk.msra.mxu1 %vm51_vm1, %v644_v58 }
 0x376   :  { %v646_v59 = vpop.eup %645  ;;  %614 = vmatprep.subr.mxu1 %v672_v0 }
 0x377   :  { %615 = vmatpush3.msra.mxu1 %v646_v59 }
 0x378   :  { %617 = vmatmul.mubr.msk.f32.vlgmr.msra.gmra.mxu1 %vm450_vm7, %v719_v13 }
 0x438   :  { %v522_v61 = vpop.f32.mrf.mxu1 }
 0x439   :  { %v523_v62 = vadd.f32 %v522_v61, %v448_v60 }
 0x43a   :  { %v618_v63 = vpop.f32.mrf.mxu1 }
 0x43b   :  { %526 = vst [vmem:[%s752_s2] sm:$0x1] %v523_v62 }
 0x43c   :  { %531 = vsyncpa [#allocation3], 1 }

</bundles_post_ra>
